<compile_context>
chip_gen: v6e
topology: v6e:2x2x1
jax: 0.10.0
libtpu: 0.0.40
codegen_flags: <defaults>
</compile_context>

<pallas_src>
import functools

import jax
import jax.numpy as jnp
from jax.experimental import pallas as pl
from jax.experimental.pallas import tpu as pltpu

_LANE = 128


# --------------------------------------------------------------------------
# helpers
# --------------------------------------------------------------------------
def _vmem_capacity_bytes():
    """Best-effort per-core VMEM capacity; conservative fallback (v7x = 64 MiB)."""
    try:
        info = pltpu.get_tpu_info()
        for name in ("vmem_capacity_bytes", "vmem_size_bytes", "vmem_bytes"):
            v = getattr(info, name, None)
            if v:
                return int(v)
    except Exception:
        pass
    return 64 * 1024 * 1024


def _make_spec(block_shape, index_map, buffers=None):
    """BlockSpec with optional deeper pipelining (graceful fallback)."""
    if buffers is not None:
        try:
            return pl.BlockSpec(block_shape, index_map,
                                pipeline_mode=pl.Buffered(buffers))
        except TypeError:
            pass
    return pl.BlockSpec(block_shape, index_map)


# --------------------------------------------------------------------------
# fused single-pass kernel (per-batch slab resident in VMEM)
# --------------------------------------------------------------------------
def _sa_fused_kernel(x_ref, o_ref, *, n_valid, need_mask):
    # x_ref: (3, M, 128) whole per-batch slab; o_ref: (1, 128) lane partials.
    x = x_ref[...].astype(jnp.float32)                       # (3, M, 128)

    # per-channel spatial mean (pad lanes are zeros -> sums unaffected)
    lane_sums = jnp.sum(x, axis=2, keepdims=True)            # (3, M, 1)
    mean = jnp.sum(lane_sums, axis=1, keepdims=True) * (1.0 / n_valid)  # (3,1,1)

    d = x - mean
    k = jnp.sqrt(d[0] * d[0] + d[1] * d[1] + d[2] * d[2])    # (M, 128)

    if need_mask:  # zero contribution of the zero-padded tail (|pad| < 128)
        m = k.shape[0]
        rows = jax.lax.broadcasted_iota(jnp.int32, (m, _LANE), 0)
        lanes = jax.lax.broadcasted_iota(jnp.int32, (m, _LANE), 1)
        k = jnp.where(rows * _LANE + lanes < n_valid, k, 0.0)

    o_ref[...] = jnp.sum(k, axis=0, keepdims=True)           # (1, 128)


# --------------------------------------------------------------------------
# streaming pass 1: per-(batch, channel) spatial sums
# --------------------------------------------------------------------------
def _sa_sum_kernel(x_ref, o_ref, *, tm, m_rows, n_blk, n_per, n_split, need_mask):
    # x_ref: (3, TM, 128) tile; o_ref: (3, 128) resident accumulator.
    bs = pl.program_id(0)
    j = pl.program_id(1)
    if n_split == 1:
        gj = j
    else:
        gj = (bs % n_split) * n_per + j       # global spatial-tile index

    @pl.when(j == 0)
    def _():
        o_ref[...] = jnp.zeros_like(o_ref)

    def accumulate(mask_tail):
        x = x_ref[...].astype(jnp.float32)                   # (3, TM, 128)
        if mask_tail:
            # rows beyond M are ragged-edge (unspecified) data -> zero them.
            rows = jax.lax.broadcasted_iota(jnp.int32, (tm, _LANE), 0) + gj * tm
            x = jnp.where((rows < m_rows)[None], x, 0.0)
        o_ref[...] += jnp.sum(x, axis=1)                     # (3, 128)

    if need_mask:
        @pl.when(gj < n_blk - 1)
        def _():
            accumulate(False)

        @pl.when(gj == n_blk - 1)
        def _():
            accumulate(True)
        # gj > n_blk - 1 (overhang tile from the 2-way split): skipped.
    else:
        if n_split > 1:
            @pl.when(gj < n_blk)
            def _():
                accumulate(False)
        else:
            accumulate(False)


# --------------------------------------------------------------------------
# streaming pass 2: deviation norm, per-batch(-split) lane partial sums
# --------------------------------------------------------------------------
def _sa_dev_kernel(mean_ref, x_ref, o_ref, *, tm, n_valid, n_blk, n_per,
                   n_split, need_mask):
    # mean_ref: (B, 3) f32 in SMEM (scalar prefetch)
    # x_ref   : (3, TM, 128) tile; o_ref: (1, 128) resident accumulator.
    bs = pl.program_id(0)
    j = pl.program_id(1)
    if n_split == 1:
        b = bs
        gj = j
    else:
        b = bs // n_split
        gj = (bs % n_split) * n_per + j

    @pl.when(j == 0)
    def _():
        o_ref[...] = jnp.zeros_like(o_ref)

    mr = mean_ref[b, 0]
    mg = mean_ref[b, 1]
    mb = mean_ref[b, 2]

    def accumulate(mask_tail):
        dr = x_ref[0].astype(jnp.float32) - mr
        dg = x_ref[1].astype(jnp.float32) - mg
        db = x_ref[2].astype(jnp.float32) - mb
        k = jnp.sqrt(dr * dr + dg * dg + db * db)            # (TM, 128)
        if mask_tail:
            rows = jax.lax.broadcasted_iota(jnp.int32, (tm, _LANE), 0)
            lanes = jax.lax.broadcasted_iota(jnp.int32, (tm, _LANE), 1)
            flat = (gj * tm + rows) * _LANE + lanes
            k = jnp.where(flat < n_valid, k, 0.0)
        o_ref[...] += jnp.sum(k, axis=0, keepdims=True)      # (1, 128)

    if need_mask:
        @pl.when(gj < n_blk - 1)
        def _():
            accumulate(False)

        @pl.when(gj == n_blk - 1)
        def _():
            accumulate(True)
    else:
        if n_split > 1:
            @pl.when(gj < n_blk)
            def _():
                accumulate(False)
        else:
            accumulate(False)


# --------------------------------------------------------------------------
# wrappers
# --------------------------------------------------------------------------
def _sa_loss_fused(x4, B, C, M, L, Lp, itemsize, fused_need, vmem_cap):
    vmem_limit = int(min(0.85 * vmem_cap, max(32 << 20, fused_need + (4 << 20))))
    kern = functools.partial(_sa_fused_kernel, n_valid=L, need_mask=(Lp != L))
    cost = pl.CostEstimate(flops=12 * B * Lp,
                           transcendentals=B * Lp,
                           bytes_accessed=B * C * Lp * itemsize + B * _LANE * 4)
    partials = pl.pallas_call(
        kern,
        out_shape=jax.ShapeDtypeStruct((B, 1, _LANE), jnp.float32),
        grid_spec=pltpu.PrefetchScalarGridSpec(
            num_scalar_prefetch=0,
            grid=(B,),
            in_specs=[pl.BlockSpec((None, C, M, _LANE), lambda b: (b, 0, 0, 0))],
            out_specs=pl.BlockSpec((None, 1, _LANE), lambda b: (b, 0, 0)),
        ),
        compiler_params=pltpu.CompilerParams(
            dimension_semantics=("parallel",),
            vmem_limit_bytes=vmem_limit),
        cost_estimate=cost,
    )(x4)
    return (jnp.sum(partials) / jnp.float32(B * L)).astype(jnp.float32)


def _sa_loss_streaming(x4, B, C, M, L, Lp, itemsize, tm_cap, quant):
    tm_cap = max(quant, (tm_cap // quant) * quant)
    TM = tm_cap if M >= tm_cap else M          # full-dim block when M is small
    n_blk = -(-M // TM)
    # Ensure a parallel grid extent >= 2 (both v7x TensorCores) when B == 1.
    n_split = 2 if (B == 1 and n_blk >= 2) else 1
    n_per = -(-n_blk // n_split)

    if n_split == 1:
        def x_map1(bs, j):
            return (bs, 0, j, 0)

        def x_map2(bs, j, mean):
            return (bs, 0, j, 0)
    else:
        def _gj(bs, j):  # clamp the (at most one) overhang tile per split
            return jnp.minimum((bs % n_split) * n_per + j, n_blk - 1)

        def x_map1(bs, j):
            return (bs // n_split, 0, _gj(bs, j), 0)

        def x_map2(bs, j, mean):
            return (bs // n_split, 0, _gj(bs, j), 0)

    cparams = pltpu.CompilerParams(
        dimension_semantics=("parallel", "arbitrary"),
        vmem_limit_bytes=32 * 1024 * 1024)

    # ---- pass 1: per-(batch, channel) spatial sums -> mean_rgb (B, 3)
    need_mask1 = (M % TM) != 0
    sum_kern = functools.partial(
        _sa_sum_kernel, tm=TM, m_rows=M, n_blk=n_blk, n_per=n_per,
        n_split=n_split, need_mask=need_mask1)
    cost1 = pl.CostEstimate(
        flops=3 * B * Lp, transcendentals=0,
        bytes_accessed=B * C * Lp * itemsize + B * n_split * C * _LANE * 4)
    ch_sums = pl.pallas_call(
        sum_kern,
        out_shape=jax.ShapeDtypeStruct((B * n_split, C, _LANE), jnp.float32),
        grid_spec=pltpu.PrefetchScalarGridSpec(
            num_scalar_prefetch=0,
            grid=(B * n_split, n_per),
            in_specs=[_make_spec((None, C, TM, _LANE), x_map1, buffers=3)],
            out_specs=pl.BlockSpec((None, C, _LANE), lambda bs, j: (bs, 0, 0)),
        ),
        compiler_params=cparams,
        cost_estimate=cost1,
    )(x4)
    mean_rgb = (ch_sums.reshape(B, n_split, C, _LANE).sum(axis=(1, 3))
                / jnp.float32(L))                                   # (B, 3) f32

    # ---- pass 2: deviation norm, per-batch(-split) partial sums
    need_mask2 = L != (n_blk * TM * _LANE)
    dev_kern = functools.partial(
        _sa_dev_kernel, tm=TM, n_valid=L, n_blk=n_blk, n_per=n_per,
        n_split=n_split, need_mask=need_mask2)
    cost2 = pl.CostEstimate(
        flops=10 * B * Lp, transcendentals=B * Lp,
        bytes_accessed=B * C * Lp * itemsize + B * C * 4 + B * n_split * _LANE * 4)
    partials = pl.pallas_call(
        dev_kern,
        out_shape=jax.ShapeDtypeStruct((B * n_split, 1, _LANE), jnp.float32),
        grid_spec=pltpu.PrefetchScalarGridSpec(
            num_scalar_prefetch=1,                # mean_rgb -> SMEM
            grid=(B * n_split, n_per),
            in_specs=[_make_spec((None, C, TM, _LANE), x_map2, buffers=3)],
            out_specs=pl.BlockSpec((None, 1, _LANE),
                                   lambda bs, j, mean: (bs, 0, 0)),
        ),
        compiler_params=cparams,
        cost_estimate=cost2,
    )(mean_rgb, x4)

    return (jnp.sum(partials) / jnp.float32(B * L)).astype(jnp.float32)


def sa_loss(x, *, force_streaming=False, tm_cap=1024):
    """x: (B, 3, H, W) float array (f32 or bf16). Returns scalar f32 loss."""
    B, C, H, W = x.shape
    assert C == 3, "Sa_Loss expects exactly 3 channels (r, g, b)"
    L = H * W
    itemsize = jnp.dtype(x.dtype).itemsize

    # Lane-dense view: (B, 3, M, 128).  Free (no copy) when L % 128 == 0;
    # otherwise only a minimal (< 128 elem per row) zero-pad is materialised.
    M = -(-L // _LANE)
    Lp = M * _LANE
    x3 = x.reshape(B, C, L)
    if Lp != L:
        x3 = jnp.pad(x3, ((0, 0), (0, 0), (0, Lp - L)))
    x4 = x3.reshape(B, C, M, _LANE)

    # Fused single-pass fast path when the per-batch slab fits VMEM
    # (double-buffered input + generous headroom for f32 temporaries).
    vmem_cap = _vmem_capacity_bytes()
    quant = 16 if itemsize < 4 else 8
    m_vmem = -(-M // quant) * quant
    slab_in = C * m_vmem * _LANE * itemsize
    slab_f32 = C * m_vmem * _LANE * 4
    fused_need = 2 * slab_in + 2 * slab_f32 + (2 << 20)
    use_fused = (not force_streaming) and (fused_need <= int(0.7 * vmem_cap))

    if use_fused:
        return _sa_loss_fused(x4, B, C, M, L, Lp, itemsize, fused_need, vmem_cap)
    return _sa_loss_streaming(x4, B, C, M, L, Lp, itemsize, tm_cap, quant)


def sa_loss_ref(x):
    """Pure-JAX reference mirroring the PyTorch forward."""
    xf = x.astype(jnp.float32)
    mean_rgb = jnp.mean(xf, axis=(2, 3), keepdims=True)
    d = xf - mean_rgb
    k = jnp.sqrt(jnp.sum(d * d, axis=1, keepdims=True))
    return jnp.mean(k)


if __name__ == "__main__":
    root = jax.random.PRNGKey(0)
    k1, k2, k3 = jax.random.split(root, 3)

    checks = []

    # 1) fused fast path, 128-aligned spatial size (no pad, single HBM pass).
    x1 = jax.random.uniform(k1, (2, 3, 16, 16), dtype=jnp.float32)
    checks.append((jax.jit(sa_loss)(x1), sa_loss_ref(x1)))

    # 2) fused fast path, non-128-aligned spatial size (ragged-tail mask).
    x2 = jax.random.uniform(k2, (2, 3, 10, 10), dtype=jnp.float32)
    checks.append((jax.jit(sa_loss)(x2), sa_loss_ref(x2)))

    # 3) streaming two-pass path (forced, tiny tiles): exercises the 2-way
    #    spatial split for B == 1, last-tile masking and overhang-tile skip.
    x3 = jax.random.uniform(k3, (1, 3, 48, 48), dtype=jnp.float32)
    stream_fn = jax.jit(functools.partial(sa_loss, force_streaming=True, tm_cap=8))
    checks.append((stream_fn(x3), sa_loss_ref(x3)))

    for out, ref in checks:
        out = jax.block_until_ready(out)
        ref = jax.block_until_ready(ref)
        assert jnp.allclose(out, ref, rtol=1e-5, atol=1e-5), (out, ref)

    print("KERNEL_OK")
</pallas_src>

<mosaic_0001>
module attributes {stable_mosaic.version = 11 : i64} {
  func.func @_sa_fused_kernel(%arg0: i32, %arg1: memref<1x3x2x128xf32, #tpu.memory_space<vmem>>, %arg2: memref<1x1x128xf32, #tpu.memory_space<vmem>>) attributes {dimension_semantics = [#tpu.dimension_semantics<parallel>], iteration_bounds = array<i64: 2>, scalar_prefetch = 0 : i64, scratch_operands = 0 : i64, tpu.core_type = #tpu.core_type<tc>, window_params = [{transform_indices = @transform_0, window_bounds = array<i64: 1, 3, 2, 128>}, {transform_indices = @transform_1, window_bounds = array<i64: 1, 1, 128>}]} {
    %c0 = arith.constant 0 : index
    %c0_0 = arith.constant 0 : index
    %c0_1 = arith.constant 0 : index
    %c0_2 = arith.constant 0 : index
    %0 = vector.load %arg1[%c0, %c0_0, %c0_1, %c0_2] : memref<1x3x2x128xf32, #tpu.memory_space<vmem>>, vector<1x3x2x128xf32>
    %1 = vector.shape_cast %0 : vector<1x3x2x128xf32> to vector<3x2x128xf32>
    %cst = arith.constant dense<0.000000e+00> : vector<3x2xf32>
    %2 = vector.multi_reduction <add>, %1, %cst [2] : vector<3x2x128xf32> to vector<3x2xf32>
    %3 = vector.shape_cast %2 : vector<3x2xf32> to vector<3x2x1xf32>
    %cst_3 = arith.constant dense<0.000000e+00> : vector<3x1xf32>
    %4 = vector.multi_reduction <add>, %3, %cst_3 [1] : vector<3x2x1xf32> to vector<3x1xf32>
    %5 = vector.shape_cast %4 : vector<3x1xf32> to vector<3x1x1xf32>
    %cst_4 = arith.constant 3.906250e-03 : f32
    %6 = vector.broadcast %cst_4 : f32 to vector<3x1x1xf32>
    %7 = arith.mulf %5, %6 : vector<3x1x1xf32>
    %8 = vector.broadcast %7 : vector<3x1x1xf32> to vector<3x2x128xf32>
    %9 = arith.subf %1, %8 : vector<3x2x128xf32>
    %10 = vector.extract_strided_slice %9 {offsets = [0, 0, 0], sizes = [1, 2, 128], strides = [1, 1, 1]} : vector<3x2x128xf32> to vector<1x2x128xf32>
    %11 = vector.shape_cast %10 : vector<1x2x128xf32> to vector<2x128xf32>
    %12 = vector.extract_strided_slice %9 {offsets = [0, 0, 0], sizes = [1, 2, 128], strides = [1, 1, 1]} : vector<3x2x128xf32> to vector<1x2x128xf32>
    %13 = vector.shape_cast %12 : vector<1x2x128xf32> to vector<2x128xf32>
    %14 = arith.mulf %11, %13 : vector<2x128xf32>
    %15 = vector.extract_strided_slice %9 {offsets = [1, 0, 0], sizes = [1, 2, 128], strides = [1, 1, 1]} : vector<3x2x128xf32> to vector<1x2x128xf32>
    %16 = vector.shape_cast %15 : vector<1x2x128xf32> to vector<2x128xf32>
    %17 = vector.extract_strided_slice %9 {offsets = [1, 0, 0], sizes = [1, 2, 128], strides = [1, 1, 1]} : vector<3x2x128xf32> to vector<1x2x128xf32>
    %18 = vector.shape_cast %17 : vector<1x2x128xf32> to vector<2x128xf32>
    %19 = arith.mulf %16, %18 : vector<2x128xf32>
    %20 = arith.addf %14, %19 : vector<2x128xf32>
    %21 = vector.extract_strided_slice %9 {offsets = [2, 0, 0], sizes = [1, 2, 128], strides = [1, 1, 1]} : vector<3x2x128xf32> to vector<1x2x128xf32>
    %22 = vector.shape_cast %21 : vector<1x2x128xf32> to vector<2x128xf32>
    %23 = vector.extract_strided_slice %9 {offsets = [2, 0, 0], sizes = [1, 2, 128], strides = [1, 1, 1]} : vector<3x2x128xf32> to vector<1x2x128xf32>
    %24 = vector.shape_cast %23 : vector<1x2x128xf32> to vector<2x128xf32>
    %25 = arith.mulf %22, %24 : vector<2x128xf32>
    %26 = arith.addf %20, %25 : vector<2x128xf32>
    %27 = math.sqrt %26 : vector<2x128xf32>
    %cst_5 = arith.constant dense<0.000000e+00> : vector<128xf32>
    %28 = vector.multi_reduction <add>, %27, %cst_5 [0] : vector<2x128xf32> to vector<128xf32>
    %29 = vector.shape_cast %28 : vector<128xf32> to vector<1x128xf32>
    %c0_6 = arith.constant 0 : index
    %c0_7 = arith.constant 0 : index
    %c0_8 = arith.constant 0 : index
    %30 = vector.load %arg2[%c0_6, %c0_7, %c0_8] : memref<1x1x128xf32, #tpu.memory_space<vmem>>, vector<1x1x128xf32>
    %31 = vector.shape_cast %30 : vector<1x1x128xf32> to vector<1x128xf32>
    %32 = vector.shape_cast %29 : vector<1x128xf32> to vector<1x1x128xf32>
    tpu.vector_store %arg2[%c0_6, %c0_7, %c0_8], %32 {strides = array<i32>} : memref<1x1x128xf32, #tpu.memory_space<vmem>>, vector<1x1x128xf32>,
    return
  }
  func.func @transform_0(%arg0: i32) -> (i32, i32, i32, i32) {
    %c0_i32 = arith.constant 0 : i32
    %c0_i32_0 = arith.constant 0 : i32
    %c0_i32_1 = arith.constant 0 : i32
    %c0_i32_2 = arith.constant 0 : i32
    return %arg0, %c0_i32, %c0_i32_0, %c0_i32_1 : i32, i32, i32, i32
  }
  func.func @transform_1(%arg0: i32) -> (i32, i32, i32) {
    %c0_i32 = arith.constant 0 : i32
    %c0_i32_0 = arith.constant 0 : i32
    %c0_i32_1 = arith.constant 0 : i32
    return %arg0, %c0_i32, %c0_i32_0 : i32, i32, i32
  }
}

</mosaic_0001>

<bundles_post_ra>
// kernel: sa_loss.1
= control target key start
LH: loop header
LB: loop body
LE: loop exit
PB: predicated region body
PF: predicated region fallthrough
CT: control target
= control target key end

     0   :  { %s257_s6 = smov 0   ;;  %s285_s0 = inlined_call_operand.vmem [shape: f32[2,3,2,128], index: 0, kind: input, shape index: {}]   ;;  %s286_s1 = inlined_call_operand.vmem [shape: f32[2,1,128], index: 1, kind: output, shape index: {}]  }
   0x1 LB: > { %s220_s7 = sadd.s32 4294967295, %s245_s6   ;;  %p224_p0 = scmp.ge.s32.totalorder %s245_s6, 1  ;;  %s245_s6 = sphi %s257_s6, %s11_s6  }
   0x2   : > { %p87_p1 = scmp.lt.s32.totalorder %s245_s6, 3 }
   0x4   : > { %p88_p2 = pnand %p224_p0, %p87_p1 }
   0x5   : > { %p105_p3 = scmp.lt.s32.totalorder (!%p88_p2), %s220_s7, 1 }
   0x6   : > { %91 = sbr.rel (%p88_p2) target bundleno = 214 (0xd6), region = 24 }
   0xb   : > { %s288_s7 = smov (!%p105_p3, %s220_s7), 1  ;;  %vm116_vm0 = vcmask 1041408  }
   0xc   : > { %s228_s8 = smul.u32 6, %s288_s7  ;;  %s112_s14 = scalar_lea.vmem %s286_s1, %s288_s7 }
   0xe   : > { %s109_s11 = scalar_lea.vmem %s285_s0, %s228_s8 }
   0xf   : > { %v115_v0 = vld [vmem:[%s109_s11 + $0x4] sm:$0x3]  ;;  %v113_v1 = vld [vmem:[%s109_s11] sm:$0x3]  ;;  %v114_v2 = vld [vmem:[%s109_s11 + $0x2] sm:$0x3] }
  0x10   : > { %v123_v3 = vsel %vm116_vm0, %v115_v0, 0.0  ;;  %v117_v4 = vsel %vm116_vm0, %v113_v1, 0.0  ;;  %v120_v5 = vsel %vm116_vm0, %v114_v2, 0.0 }
  0x11   : > { %124 = vadd.xlane.f32.xlu1 %v123_v3  ;;  %118 = vadd.xlane.f32.xlu0 %v117_v4 }
  0x15   : > { %121 = vadd.xlane.f32.xlu0 %v120_v5 }
  0x9a   : > { %v125_v6 = vpop.xlane.xlu1 %124  ;;  %v119_v7 = vpop.xlane.xlu0 %118 }
  0x9b   : > { %v140_v8 = vsel %vm116_vm0, %v125_v6, 0.0  ;;  %v126_v9 = vsel %vm116_vm0, %v119_v7, 0.0 }
  0x9c   : > { %v141_v10 = vrot.slane %v140_v8, 4  ;;  %v127_v11 = vrot.slane %v126_v9, 4 }
  0x9e   : > { %v142_v12 = vadd.f32 %v141_v10, %v140_v8  ;;  %v128_v13 = vadd.f32 %v127_v11, %v126_v9  ;;  %v122_v14 = vpop.xlane.xlu0 %121 }
  0x9f   : > { %v133_v15 = vsel %vm116_vm0, %v122_v14, 0.0 }
  0xa0   : > { %v143_v16 = vrot.slane %v142_v12, 2  ;;  %v129_v17 = vrot.slane %v128_v13, 2  ;;  %v134_v18 = vrot.slane %v133_v15, 4 }
  0xa2   : > { %v144_v19 = vadd.f32 %v143_v16, %v142_v12  ;;  %v130_v20 = vadd.f32 %v129_v17, %v128_v13  ;;  %v135_v21 = vadd.f32 %v134_v18, %v133_v15 }
  0xa4   : > { %v145_v22 = vrot.slane %v144_v19, 1  ;;  %v131_v23 = vrot.slane %v130_v20, 1  ;;  %v136_v24 = vrot.slane %v135_v21, 2 }
  0xa6   : > { %v146_v25 = vadd.f32 %v145_v22, %v144_v19  ;;  %v132_v26 = vadd.f32 %v131_v23, %v130_v20  ;;  %v137_v27 = vadd.f32 %v136_v24, %v135_v21 }
  0xa8   : > { %v147_v28 = vmul.f32 0.00390625, %v132_v26  ;;  %v138_v29 = vrot.slane %v137_v27, 1  ;;  %v149_v30 = vmul.f32 0.00390625, %v146_v25 }
  0xaa   : > { %v139_v31 = vadd.f32 %v138_v29, %v137_v27  ;;  %v150_v32 = vsub.f32 %v113_v1, %v147_v28  ;;  %v152_v34 = vsub.f32 %v115_v0, %v149_v30 }
  0xac   : > { %v148_v33 = vmul.f32 0.00390625, %v139_v31  ;;  %v153_v36 = vmul.f32 %v150_v32, %v150_v32  ;;  %v156_v38 = vmul.f32 %v152_v34, %v152_v34 }
  0xae   : > { %v151_v35 = vsub.f32 %v114_v2, %v148_v33 }
  0xb0   : > { %v154_v37 = vmul.f32 %v151_v35, %v151_v35 }
  0xb2   : > { %v155_v39 = vadd.f32 %v154_v37, %v153_v36 }
  0xb4   : > { %v157_v40 = vadd.f32 %v156_v38, %v155_v39 }
  0xb6   : > { %237 = vrsqrt.f32 %v157_v40  ;;  %vm160_vm1 = vcmp.eq.f32.partialorder %v157_v40, inf  ;;  %v163_v43 = vand.u32 2147483648, %v157_v40  ;;  %vm162_vm2 = vcmp.eq.f32.partialorder %v157_v40, 0.0 }
  0xc3   : > { %v238_v41 = vpop.eup %237 }
  0xc4   : > { %v159_v42 = vmul.f32 %v238_v41, %v157_v40 }
  0xc6   : > { %v161_v44 = vsel %vm160_vm1, %v157_v40, %v159_v42 }
  0xc7   : > { %v164_v45 = vsel %vm162_vm2, %v163_v43, %v161_v44 }
  0xc8   : > { %v165_v46 = vsel %vm116_vm0, %v164_v45, 0.0 }
  0xc9   : > { %v166_v47 = vrot.slane %v165_v46, 4 }
  0xcb   : > { %v167_v48 = vadd.f32 %v166_v47, %v165_v46 }
  0xcd   : > { %v168_v49 = vrot.slane %v167_v48, 2 }
  0xcf   : > { %v169_v50 = vadd.f32 %v168_v49, %v167_v48 }
  0xd1   : > { %v170_v51 = vrot.slane %v169_v50, 1 }
  0xd3   : > { %v171_v52 = vadd.f32 %v170_v51, %v169_v50 }
  0xd5   : > { %172 = vst [vmem:[%s112_s14] sm:$0x1] %v171_v52 }
  0xd6 PF: > { %s11_s6 = sadd.s32 1, %s245_s6  }
  0xd7   : > { %p8_p4 = scmp.ge.s32.totalorder %s11_s6, 4  }
  0xd9   :  { %10 = sbr.rel (!%p8_p4) target bundleno = 1 (0x1), region = 54 }

</bundles_post_ra>
